<compile_context>
chip_gen: v6e
topology: v6e:2x2x1
jax: 0.10.0
libtpu: 0.0.40
codegen_flags: <defaults>
</compile_context>

<pallas_src>
import jax
import jax.numpy as jnp
from jax import lax
from jax.experimental import pallas as pl
from jax.experimental.pallas import tpu as pltpu

TAU = 2.0
V_TH = 1.0


# ----------------------------------------------------------------------------- helpers
def _round_up(x, m):
    return (x + m - 1) // m * m


def _lane_tile(dim_padded, cap):
    """Largest multiple of 128 that divides dim_padded (itself a 128-multiple), <= cap."""
    t = min(cap, dim_padded)
    t = (t // 128) * 128
    while dim_padded % t != 0:
        t -= 128
    return t


def _pick_time_block(T, B, target_rows=512):
    """Timesteps per M-block.  TB must divide T (no M padding, whole timesteps per block)
    and tm = TB*B must be sublane-aligned (multiple of 8) unless it is the full M extent.
    Aim for tm near the measured 512-row sweet spot."""
    for d in range(T, 0, -1):
        if T % d != 0:
            continue
        tm = d * B
        if tm <= target_rows and tm % 8 == 0:
            return d
    # Fallback (e.g. prime T with odd B): a single M block covering all of M.
    # Block dim == full array dim is always legal; VMEM use grows with T*B here.
    return T


# ----------------------------------------------------------------------------- fused kernel
def _make_fused_kernel(TB, B):
    """GEMM (+bias) with a LIF-scan epilogue.  TB timesteps per M-block, batch B."""
    inv_tau = 1.0 / TAU

    def kernel(x_ref, w_ref, b_ref, s_ref, acc_ref, v_ref):
        i = pl.program_id(1)          # M / time block (sequential recurrence)
        k = pl.program_id(2)          # K tile (innermost, accumulator axis)

        # Membrane state persists across M blocks; reset once per N tile.
        @pl.when(jnp.logical_and(i == 0, k == 0))
        def _():
            v_ref[...] = jnp.zeros_like(v_ref)

        @pl.when(k == 0)
        def _():
            acc_ref[...] = jnp.zeros_like(acc_ref)

        acc_ref[...] += jnp.dot(x_ref[...], w_ref[...],
                                preferred_element_type=jnp.float32)

        # Epilogue after the last K tile: bias add + LIF recurrence, spikes out.
        @pl.when(k == pl.num_programs(2) - 1)
        def _():
            tn = s_ref.shape[2]
            bias = jnp.broadcast_to(b_ref[...], (B, tn))   # hoisted broadcast
            v = v_ref[...]                                  # (B, tn) f32

            if TB <= 64:
                # Fully unrolled: every accumulator slice offset is a compile-time const.
                for t in range(TB):
                    y_t = acc_ref[pl.ds(t * B, B), :] + bias
                    v = v + (y_t - v) * inv_tau             # decay_input=True
                    fired = v >= V_TH
                    s_ref[t] = fired.astype(s_ref.dtype)
                    v = jnp.where(fired, 0.0, v)            # hard reset (v_reset=0)
                v_ref[...] = v
            else:
                def step(t, v):
                    off = pl.multiple_of(t * B, B)
                    y_t = acc_ref[pl.ds(off, B), :] + bias
                    v = v + (y_t - v) * inv_tau
                    fired = v >= V_TH
                    s_ref[t] = fired.astype(s_ref.dtype)
                    return jnp.where(fired, 0.0, v)
                # Cap unroll so live vregs stay well under 64 for large (B, tn) tiles.
                v_ref[...] = lax.fori_loop(0, TB, step, v, unroll=8)

    return kernel


# ----------------------------------------------------------------------------- wrapper
def attlif_forward(x, w, b, *, matmul_dtype=jnp.bfloat16):
    """x: [T, B, C_in] f32, w: [C_in, C_out] f32, b: [C_out] f32 -> spikes [T, B, C_out] f32.

    matmul_dtype: dtype of the MXU inputs (default bf16 on all TPU generations);
    accumulation and all LIF arithmetic are always f32.  Pass None for f32 MXU inputs.
    """
    T, B, C_in = x.shape
    C_out = w.shape[1]
    M = T * B

    # ---- tiling: lane-align K/N, whole-timestep M blocks (no M padding) ----------------
    Kp = _round_up(C_in, 128)
    Np = _round_up(C_out, 128)
    tk = _lane_tile(Kp, 256)
    tn = _lane_tile(Np, 512)
    TB = _pick_time_block(T, B, target_rows=512)
    tm = TB * B

    mm_dtype = jnp.float32 if matmul_dtype is None else matmul_dtype

    # Single fused HBM pass over x: reshape + K-pad + cast in one expression.
    x2 = x.reshape(M, C_in)
    if Kp != C_in:
        x2 = jnp.pad(x2, ((0, 0), (0, Kp - C_in)))
    x2 = x2.astype(mm_dtype)

    wp = w
    if (Kp, Np) != (C_in, C_out):
        # Zero padding => padded output columns get y = 0 < V_TH and never spike.
        wp = jnp.pad(w, ((0, Kp - C_in), (0, Np - C_out)))
    wp = wp.astype(mm_dtype)
    bp = (jnp.pad(b, (0, Np - C_out)) if Np != C_out else b)
    bp = bp.reshape(1, Np).astype(jnp.float32)

    kernel = _make_fused_kernel(TB, B)

    spikes = pl.pallas_call(
        kernel,
        out_shape=jax.ShapeDtypeStruct((T, B, Np), jnp.float32),
        grid_spec=pltpu.PrefetchScalarGridSpec(
            num_scalar_prefetch=0,
            grid=(Np // tn, M // tm, Kp // tk),     # (N parallel, time arbitrary, K arbitrary)
            in_specs=[
                pl.BlockSpec((tm, tk), lambda j, i, k: (i, k)),   # X tile
                pl.BlockSpec((tk, tn), lambda j, i, k: (k, j)),   # W tile
                pl.BlockSpec((1, tn), lambda j, i, k: (0, j)),    # bias tile
            ],
            out_specs=pl.BlockSpec((TB, B, tn), lambda j, i, k: (i, 0, j)),  # spikes
            scratch_shapes=[
                pltpu.VMEM((tm, tn), jnp.float32),   # f32 GEMM accumulator
                pltpu.VMEM((B, tn), jnp.float32),    # membrane potential (persists over time)
            ],
        ),
        compiler_params=pltpu.CompilerParams(
            dimension_semantics=("parallel", "arbitrary", "arbitrary"),
            # ~4-5 MiB of live tiles at tm=512/tn=512; 32 MiB fits v5e/v6e/v7x scoped VMEM.
            vmem_limit_bytes=32 * 1024 * 1024,
        ),
    )(x2, wp, bp)

    # Keep the module's output contract [T, B, C_out]; a consumer that accepts N-padded
    # activations could skip this slice to save one HBM pass.
    if Np != C_out:
        spikes = spikes[:, :, :C_out]
    return spikes


# ----------------------------------------------------------------------------- reference
def attlif_reference(x, w, b, *, matmul_dtype=None):
    """Pure-JAX reference.  Returns (spikes, pre-reset membrane potentials)."""
    xw = x if matmul_dtype is None else x.astype(matmul_dtype)
    ww = w if matmul_dtype is None else w.astype(matmul_dtype)
    y = jnp.einsum("tbi,io->tbo", xw, ww, preferred_element_type=jnp.float32) + b
    T = x.shape[0]
    v = jnp.zeros(y.shape[1:], jnp.float32)
    spikes, v_pre = [], []
    for t in range(T):
        v = v + (y[t] - v) / TAU
        v_pre.append(v)
        s = (v >= V_TH).astype(jnp.float32)
        v = v * (1.0 - s)
        spikes.append(s)
    return jnp.stack(spikes, axis=0), jnp.stack(v_pre, axis=0)


# TODO(synk): only the forward pass is implemented; the ATan surrogate gradient of the
# spiking nonlinearity (backward-only in spikingjelly) has no forward-pass equivalent.

if __name__ == "__main__":
    # Small shapes consistent with the module: seq T=8, batch B=2, in=32, out=32.
    T, B, C_in, C_out = 8, 2, 32, 32

    key = jax.random.PRNGKey(0)
    kx, kw, kb = jax.random.split(key, 3)

    # Deterministic init mimicking nn.Linear's uniform(-1/sqrt(in), 1/sqrt(in)).
    bound = 1.0 / jnp.sqrt(jnp.float32(C_in))
    w = jax.random.uniform(kw, (C_in, C_out), jnp.float32, -bound, bound)
    b = jax.random.uniform(kb, (C_out,), jnp.float32, -bound, bound)

    # Input scaled so some membrane potentials actually cross threshold.
    x = 2.0 * jax.random.normal(kx, (T, B, C_in), jnp.float32)

    out = attlif_forward(x, w, b)              # default bf16 MXU path, f32 LIF math
    out = jax.block_until_ready(out)
    assert out.shape == (T, B, C_out)

    # Reference uses the same bf16-cast MXU inputs so y matches the kernel; hard-threshold
    # spikes may still flip when v is within float noise of V_TH, so mask borderline
    # elements and require exact agreement everywhere else.
    ref_spikes, ref_v_pre = attlif_reference(x, w, b, matmul_dtype=jnp.bfloat16)
    borderline = jnp.abs(ref_v_pre - V_TH) < 1e-3
    mismatch = jnp.logical_and(out != ref_spikes, jnp.logical_not(borderline))
    assert not bool(jnp.any(mismatch)), "Pallas spikes mismatch vs reference"

    print("KERNEL_OK")
</pallas_src>

<mosaic_0001>
module attributes {stable_mosaic.version = 11 : i64} {
  func.func @kernel(%arg0: i32, %arg1: i32, %arg2: i32, %arg3: memref<16x128xbf16, #tpu.memory_space<vmem>>, %arg4: memref<128x128xbf16, #tpu.memory_space<vmem>>, %arg5: memref<1x128xf32, #tpu.memory_space<vmem>>, %arg6: memref<8x2x128xf32, #tpu.memory_space<vmem>>, %arg7: memref<16x128xf32, #tpu.memory_space<vmem>>, %arg8: memref<2x128xf32, #tpu.memory_space<vmem>>) attributes {dimension_semantics = [#tpu.dimension_semantics<parallel>, #tpu.dimension_semantics<arbitrary>, #tpu.dimension_semantics<arbitrary>], iteration_bounds = array<i64: 1, 1, 1>, scalar_prefetch = 0 : i64, scratch_operands = 2 : i64, tpu.core_type = #tpu.core_type<tc>, window_params = [{transform_indices = @transform_0, window_bounds = array<i64: 16, 128>}, {transform_indices = @transform_1, window_bounds = array<i64: 128, 128>}, {transform_indices = @transform_2, window_bounds = array<i64: 1, 128>}, {transform_indices = @transform_3, window_bounds = array<i64: 8, 2, 128>}]} {
    %c0_i32 = arith.constant 0 : i32
    %0 = arith.cmpi eq, %arg1, %c0_i32 : i32
    %c0_i32_0 = arith.constant 0 : i32
    %1 = arith.cmpi eq, %arg2, %c0_i32_0 : i32
    %2 = arith.andi %0, %1 : i1
    %3 = arith.extui %2 : i1 to i32
    %c0_i32_1 = arith.constant 0 : i32
    %4 = arith.cmpi ne, %3, %c0_i32_1 : i32
    scf.if %4 {
      %cst_13 = arith.constant 0.000000e+00 : f32
      %17 = vector.broadcast %cst_13 : f32 to vector<2x128xf32>
      %c0_14 = arith.constant 0 : index
      %c0_15 = arith.constant 0 : index
      %18 = vector.load %arg8[%c0_14, %c0_15] : memref<2x128xf32, #tpu.memory_space<vmem>>, vector<2x128xf32>
      tpu.vector_store %arg8[%c0_14, %c0_15], %17 {strides = array<i32>} : memref<2x128xf32, #tpu.memory_space<vmem>>, vector<2x128xf32>,
    } else {
    }
    %c0_i32_2 = arith.constant 0 : i32
    %5 = arith.cmpi eq, %arg2, %c0_i32_2 : i32
    %6 = arith.extui %5 : i1 to i32
    %c0_i32_3 = arith.constant 0 : i32
    %7 = arith.cmpi ne, %6, %c0_i32_3 : i32
    scf.if %7 {
      %cst_13 = arith.constant 0.000000e+00 : f32
      %17 = vector.broadcast %cst_13 : f32 to vector<16x128xf32>
      %c0_14 = arith.constant 0 : index
      %c0_15 = arith.constant 0 : index
      %18 = vector.load %arg7[%c0_14, %c0_15] : memref<16x128xf32, #tpu.memory_space<vmem>>, vector<16x128xf32>
      tpu.vector_store %arg7[%c0_14, %c0_15], %17 {strides = array<i32>} : memref<16x128xf32, #tpu.memory_space<vmem>>, vector<16x128xf32>,
    } else {
    }
    %c0 = arith.constant 0 : index
    %c0_4 = arith.constant 0 : index
    %8 = vector.load %arg7[%c0, %c0_4] : memref<16x128xf32, #tpu.memory_space<vmem>>, vector<16x128xf32>
    %c0_5 = arith.constant 0 : index
    %c0_6 = arith.constant 0 : index
    %9 = vector.load %arg3[%c0_5, %c0_6] : memref<16x128xbf16, #tpu.memory_space<vmem>>, vector<16x128xbf16>
    %c0_7 = arith.constant 0 : index
    %c0_8 = arith.constant 0 : index
    %10 = vector.load %arg4[%c0_7, %c0_8] : memref<128x128xbf16, #tpu.memory_space<vmem>>, vector<128x128xbf16>
    %cst = arith.constant dense<0.000000e+00> : vector<16x128xf32>
    %11 = tpu.matmul %9, %10, %cst {dimension_numbers = #tpu.dot_dimension_numbers<[1], [0], [0], [1], [0, 0, 1, 1], [], []>} : vector<16x128xbf16>, vector<128x128xbf16>, vector<16x128xf32> -> vector<16x128xf32>
    %12 = arith.addf %8, %11 : vector<16x128xf32>
    %c0_9 = arith.constant 0 : index
    %c0_10 = arith.constant 0 : index
    %13 = vector.load %arg7[%c0_9, %c0_10] : memref<16x128xf32, #tpu.memory_space<vmem>>, vector<16x128xf32>
    tpu.vector_store %arg7[%c0_9, %c0_10], %12 {strides = array<i32>} : memref<16x128xf32, #tpu.memory_space<vmem>>, vector<16x128xf32>,
    %c0_i32_11 = arith.constant 0 : i32
    %14 = arith.cmpi eq, %arg2, %c0_i32_11 : i32
    %15 = arith.extui %14 : i1 to i32
    %c0_i32_12 = arith.constant 0 : i32
    %16 = arith.cmpi ne, %15, %c0_i32_12 : i32
    scf.if %16 {
      %c0_13 = arith.constant 0 : index
      %c0_14 = arith.constant 0 : index
      %17 = vector.load %arg5[%c0_13, %c0_14] : memref<1x128xf32, #tpu.memory_space<vmem>>, vector<1x128xf32>
      %18 = vector.shape_cast %17 : vector<1x128xf32> to vector<1x128xf32>
      %19 = vector.broadcast %18 : vector<1x128xf32> to vector<2x128xf32>
      %c0_15 = arith.constant 0 : index
      %c0_16 = arith.constant 0 : index
      %20 = vector.load %arg8[%c0_15, %c0_16] : memref<2x128xf32, #tpu.memory_space<vmem>>, vector<2x128xf32>
      %c0_17 = arith.constant 0 : index
      %c0_18 = arith.constant 0 : index
      %21 = vector.load %arg7[%c0_17, %c0_18] : memref<16x128xf32, #tpu.memory_space<vmem>>, vector<2x128xf32>
      %22 = arith.addf %21, %19 : vector<2x128xf32>
      %23 = arith.subf %22, %20 : vector<2x128xf32>
      %cst_19 = arith.constant 5.000000e-01 : f32
      %24 = vector.broadcast %cst_19 : f32 to vector<2x128xf32>
      %25 = arith.mulf %23, %24 : vector<2x128xf32>
      %26 = arith.addf %20, %25 : vector<2x128xf32>
      %cst_20 = arith.constant 1.000000e+00 : f32
      %27 = vector.broadcast %cst_20 : f32 to vector<2x128xf32>
      %28 = arith.cmpf oge, %26, %27 : vector<2x128xf32>
      %29 = arith.extui %28 : vector<2x128xi1> to vector<2x128xi32>
      %30 = arith.sitofp %29 : vector<2x128xi32> to vector<2x128xf32>
      %c0_21 = arith.constant 0 : index
      %c0_22 = arith.constant 0 : index
      %c0_23 = arith.constant 0 : index
      %31 = vector.load %arg6[%c0_21, %c0_22, %c0_23] : memref<8x2x128xf32, #tpu.memory_space<vmem>>, vector<1x2x128xf32>
      %32 = vector.shape_cast %31 : vector<1x2x128xf32> to vector<2x128xf32>
      %33 = vector.shape_cast %30 : vector<2x128xf32> to vector<1x2x128xf32>
      tpu.vector_store %arg6[%c0_21, %c0_22, %c0_23], %33 {strides = array<i32>} : memref<8x2x128xf32, #tpu.memory_space<vmem>>, vector<1x2x128xf32>,
      %cst_24 = arith.constant 0.000000e+00 : f32
      %34 = vector.broadcast %cst_24 : f32 to vector<2x128xf32>
      %35 = arith.select %28, %34, %26 : vector<2x128xi1>, vector<2x128xf32>
      %c2 = arith.constant 2 : index
      %c0_25 = arith.constant 0 : index
      %36 = vector.load %arg7[%c2, %c0_25] : memref<16x128xf32, #tpu.memory_space<vmem>>, vector<2x128xf32>
      %37 = arith.addf %36, %19 : vector<2x128xf32>
      %38 = arith.subf %37, %35 : vector<2x128xf32>
      %cst_26 = arith.constant 5.000000e-01 : f32
      %39 = vector.broadcast %cst_26 : f32 to vector<2x128xf32>
      %40 = arith.mulf %38, %39 : vector<2x128xf32>
      %41 = arith.addf %35, %40 : vector<2x128xf32>
      %cst_27 = arith.constant 1.000000e+00 : f32
      %42 = vector.broadcast %cst_27 : f32 to vector<2x128xf32>
      %43 = arith.cmpf oge, %41, %42 : vector<2x128xf32>
      %44 = arith.extui %43 : vector<2x128xi1> to vector<2x128xi32>
      %45 = arith.sitofp %44 : vector<2x128xi32> to vector<2x128xf32>
      %c1 = arith.constant 1 : index
      %c0_28 = arith.constant 0 : index
      %c0_29 = arith.constant 0 : index
      %46 = vector.load %arg6[%c1, %c0_28, %c0_29] : memref<8x2x128xf32, #tpu.memory_space<vmem>>, vector<1x2x128xf32>
      %47 = vector.shape_cast %46 : vector<1x2x128xf32> to vector<2x128xf32>
      %48 = vector.shape_cast %45 : vector<2x128xf32> to vector<1x2x128xf32>
      tpu.vector_store %arg6[%c1, %c0_28, %c0_29], %48 {strides = array<i32>} : memref<8x2x128xf32, #tpu.memory_space<vmem>>, vector<1x2x128xf32>,
      %cst_30 = arith.constant 0.000000e+00 : f32
      %49 = vector.broadcast %cst_30 : f32 to vector<2x128xf32>
      %50 = arith.select %43, %49, %41 : vector<2x128xi1>, vector<2x128xf32>
      %c4 = arith.constant 4 : index
      %c0_31 = arith.constant 0 : index
      %51 = vector.load %arg7[%c4, %c0_31] : memref<16x128xf32, #tpu.memory_space<vmem>>, vector<2x128xf32>
      %52 = arith.addf %51, %19 : vector<2x128xf32>
      %53 = arith.subf %52, %50 : vector<2x128xf32>
      %cst_32 = arith.constant 5.000000e-01 : f32
      %54 = vector.broadcast %cst_32 : f32 to vector<2x128xf32>
      %55 = arith.mulf %53, %54 : vector<2x128xf32>
      %56 = arith.addf %50, %55 : vector<2x128xf32>
      %cst_33 = arith.constant 1.000000e+00 : f32
      %57 = vector.broadcast %cst_33 : f32 to vector<2x128xf32>
      %58 = arith.cmpf oge, %56, %57 : vector<2x128xf32>
      %59 = arith.extui %58 : vector<2x128xi1> to vector<2x128xi32>
      %60 = arith.sitofp %59 : vector<2x128xi32> to vector<2x128xf32>
      %c2_34 = arith.constant 2 : index
      %c0_35 = arith.constant 0 : index
      %c0_36 = arith.constant 0 : index
      %61 = vector.load %arg6[%c2_34, %c0_35, %c0_36] : memref<8x2x128xf32, #tpu.memory_space<vmem>>, vector<1x2x128xf32>
      %62 = vector.shape_cast %61 : vector<1x2x128xf32> to vector<2x128xf32>
      %63 = vector.shape_cast %60 : vector<2x128xf32> to vector<1x2x128xf32>
      tpu.vector_store %arg6[%c2_34, %c0_35, %c0_36], %63 {strides = array<i32>} : memref<8x2x128xf32, #tpu.memory_space<vmem>>, vector<1x2x128xf32>,
      %cst_37 = arith.constant 0.000000e+00 : f32
      %64 = vector.broadcast %cst_37 : f32 to vector<2x128xf32>
      %65 = arith.select %58, %64, %56 : vector<2x128xi1>, vector<2x128xf32>
      %c6 = arith.constant 6 : index
      %c0_38 = arith.constant 0 : index
      %66 = vector.load %arg7[%c6, %c0_38] : memref<16x128xf32, #tpu.memory_space<vmem>>, vector<2x128xf32>
      %67 = arith.addf %66, %19 : vector<2x128xf32>
      %68 = arith.subf %67, %65 : vector<2x128xf32>
      %cst_39 = arith.constant 5.000000e-01 : f32
      %69 = vector.broadcast %cst_39 : f32 to vector<2x128xf32>
      %70 = arith.mulf %68, %69 : vector<2x128xf32>
      %71 = arith.addf %65, %70 : vector<2x128xf32>
      %cst_40 = arith.constant 1.000000e+00 : f32
      %72 = vector.broadcast %cst_40 : f32 to vector<2x128xf32>
      %73 = arith.cmpf oge, %71, %72 : vector<2x128xf32>
      %74 = arith.extui %73 : vector<2x128xi1> to vector<2x128xi32>
      %75 = arith.sitofp %74 : vector<2x128xi32> to vector<2x128xf32>
      %c3 = arith.constant 3 : index
      %c0_41 = arith.constant 0 : index
      %c0_42 = arith.constant 0 : index
      %76 = vector.load %arg6[%c3, %c0_41, %c0_42] : memref<8x2x128xf32, #tpu.memory_space<vmem>>, vector<1x2x128xf32>
      %77 = vector.shape_cast %76 : vector<1x2x128xf32> to vector<2x128xf32>
      %78 = vector.shape_cast %75 : vector<2x128xf32> to vector<1x2x128xf32>
      tpu.vector_store %arg6[%c3, %c0_41, %c0_42], %78 {strides = array<i32>} : memref<8x2x128xf32, #tpu.memory_space<vmem>>, vector<1x2x128xf32>,
      %cst_43 = arith.constant 0.000000e+00 : f32
      %79 = vector.broadcast %cst_43 : f32 to vector<2x128xf32>
      %80 = arith.select %73, %79, %71 : vector<2x128xi1>, vector<2x128xf32>
      %c8 = arith.constant 8 : index
      %c0_44 = arith.constant 0 : index
      %81 = vector.load %arg7[%c8, %c0_44] : memref<16x128xf32, #tpu.memory_space<vmem>>, vector<2x128xf32>
      %82 = arith.addf %81, %19 : vector<2x128xf32>
      %83 = arith.subf %82, %80 : vector<2x128xf32>
      %cst_45 = arith.constant 5.000000e-01 : f32
      %84 = vector.broadcast %cst_45 : f32 to vector<2x128xf32>
      %85 = arith.mulf %83, %84 : vector<2x128xf32>
      %86 = arith.addf %80, %85 : vector<2x128xf32>
      %cst_46 = arith.constant 1.000000e+00 : f32
      %87 = vector.broadcast %cst_46 : f32 to vector<2x128xf32>
      %88 = arith.cmpf oge, %86, %87 : vector<2x128xf32>
      %89 = arith.extui %88 : vector<2x128xi1> to vector<2x128xi32>
      %90 = arith.sitofp %89 : vector<2x128xi32> to vector<2x128xf32>
      %c4_47 = arith.constant 4 : index
      %c0_48 = arith.constant 0 : index
      %c0_49 = arith.constant 0 : index
      %91 = vector.load %arg6[%c4_47, %c0_48, %c0_49] : memref<8x2x128xf32, #tpu.memory_space<vmem>>, vector<1x2x128xf32>
      %92 = vector.shape_cast %91 : vector<1x2x128xf32> to vector<2x128xf32>
      %93 = vector.shape_cast %90 : vector<2x128xf32> to vector<1x2x128xf32>
      tpu.vector_store %arg6[%c4_47, %c0_48, %c0_49], %93 {strides = array<i32>} : memref<8x2x128xf32, #tpu.memory_space<vmem>>, vector<1x2x128xf32>,
      %cst_50 = arith.constant 0.000000e+00 : f32
      %94 = vector.broadcast %cst_50 : f32 to vector<2x128xf32>
      %95 = arith.select %88, %94, %86 : vector<2x128xi1>, vector<2x128xf32>
      %c10 = arith.constant 10 : index
      %c0_51 = arith.constant 0 : index
      %96 = vector.load %arg7[%c10, %c0_51] : memref<16x128xf32, #tpu.memory_space<vmem>>, vector<2x128xf32>
      %97 = arith.addf %96, %19 : vector<2x128xf32>
      %98 = arith.subf %97, %95 : vector<2x128xf32>
      %cst_52 = arith.constant 5.000000e-01 : f32
      %99 = vector.broadcast %cst_52 : f32 to vector<2x128xf32>
      %100 = arith.mulf %98, %99 : vector<2x128xf32>
      %101 = arith.addf %95, %100 : vector<2x128xf32>
      %cst_53 = arith.constant 1.000000e+00 : f32
      %102 = vector.broadcast %cst_53 : f32 to vector<2x128xf32>
      %103 = arith.cmpf oge, %101, %102 : vector<2x128xf32>
      %104 = arith.extui %103 : vector<2x128xi1> to vector<2x128xi32>
      %105 = arith.sitofp %104 : vector<2x128xi32> to vector<2x128xf32>
      %c5 = arith.constant 5 : index
      %c0_54 = arith.constant 0 : index
      %c0_55 = arith.constant 0 : index
      %106 = vector.load %arg6[%c5, %c0_54, %c0_55] : memref<8x2x128xf32, #tpu.memory_space<vmem>>, vector<1x2x128xf32>
      %107 = vector.shape_cast %106 : vector<1x2x128xf32> to vector<2x128xf32>
      %108 = vector.shape_cast %105 : vector<2x128xf32> to vector<1x2x128xf32>
      tpu.vector_store %arg6[%c5, %c0_54, %c0_55], %108 {strides = array<i32>} : memref<8x2x128xf32, #tpu.memory_space<vmem>>, vector<1x2x128xf32>,
      %cst_56 = arith.constant 0.000000e+00 : f32
      %109 = vector.broadcast %cst_56 : f32 to vector<2x128xf32>
      %110 = arith.select %103, %109, %101 : vector<2x128xi1>, vector<2x128xf32>
      %c12 = arith.constant 12 : index
      %c0_57 = arith.constant 0 : index
      %111 = vector.load %arg7[%c12, %c0_57] : memref<16x128xf32, #tpu.memory_space<vmem>>, vector<2x128xf32>
      %112 = arith.addf %111, %19 : vector<2x128xf32>
      %113 = arith.subf %112, %110 : vector<2x128xf32>
      %cst_58 = arith.constant 5.000000e-01 : f32
      %114 = vector.broadcast %cst_58 : f32 to vector<2x128xf32>
      %115 = arith.mulf %113, %114 : vector<2x128xf32>
      %116 = arith.addf %110, %115 : vector<2x128xf32>
      %cst_59 = arith.constant 1.000000e+00 : f32
      %117 = vector.broadcast %cst_59 : f32 to vector<2x128xf32>
      %118 = arith.cmpf oge, %116, %117 : vector<2x128xf32>
      %119 = arith.extui %118 : vector<2x128xi1> to vector<2x128xi32>
      %120 = arith.sitofp %119 : vector<2x128xi32> to vector<2x128xf32>
      %c6_60 = arith.constant 6 : index
      %c0_61 = arith.constant 0 : index
      %c0_62 = arith.constant 0 : index
      %121 = vector.load %arg6[%c6_60, %c0_61, %c0_62] : memref<8x2x128xf32, #tpu.memory_space<vmem>>, vector<1x2x128xf32>
      %122 = vector.shape_cast %121 : vector<1x2x128xf32> to vector<2x128xf32>
      %123 = vector.shape_cast %120 : vector<2x128xf32> to vector<1x2x128xf32>
      tpu.vector_store %arg6[%c6_60, %c0_61, %c0_62], %123 {strides = array<i32>} : memref<8x2x128xf32, #tpu.memory_space<vmem>>, vector<1x2x128xf32>,
      %cst_63 = arith.constant 0.000000e+00 : f32
      %124 = vector.broadcast %cst_63 : f32 to vector<2x128xf32>
      %125 = arith.select %118, %124, %116 : vector<2x128xi1>, vector<2x128xf32>
      %c14 = arith.constant 14 : index
      %c0_64 = arith.constant 0 : index
      %126 = vector.load %arg7[%c14, %c0_64] : memref<16x128xf32, #tpu.memory_space<vmem>>, vector<2x128xf32>
      %127 = arith.addf %126, %19 : vector<2x128xf32>
      %128 = arith.subf %127, %125 : vector<2x128xf32>
      %cst_65 = arith.constant 5.000000e-01 : f32
      %129 = vector.broadcast %cst_65 : f32 to vector<2x128xf32>
      %130 = arith.mulf %128, %129 : vector<2x128xf32>
      %131 = arith.addf %125, %130 : vector<2x128xf32>
      %cst_66 = arith.constant 1.000000e+00 : f32
      %132 = vector.broadcast %cst_66 : f32 to vector<2x128xf32>
      %133 = arith.cmpf oge, %131, %132 : vector<2x128xf32>
      %134 = arith.extui %133 : vector<2x128xi1> to vector<2x128xi32>
      %135 = arith.sitofp %134 : vector<2x128xi32> to vector<2x128xf32>
      %c7 = arith.constant 7 : index
      %c0_67 = arith.constant 0 : index
      %c0_68 = arith.constant 0 : index
      %136 = vector.load %arg6[%c7, %c0_67, %c0_68] : memref<8x2x128xf32, #tpu.memory_space<vmem>>, vector<1x2x128xf32>
      %137 = vector.shape_cast %136 : vector<1x2x128xf32> to vector<2x128xf32>
      %138 = vector.shape_cast %135 : vector<2x128xf32> to vector<1x2x128xf32>
      tpu.vector_store %arg6[%c7, %c0_67, %c0_68], %138 {strides = array<i32>} : memref<8x2x128xf32, #tpu.memory_space<vmem>>, vector<1x2x128xf32>,
      %cst_69 = arith.constant 0.000000e+00 : f32
      %139 = vector.broadcast %cst_69 : f32 to vector<2x128xf32>
      %140 = arith.select %133, %139, %131 : vector<2x128xi1>, vector<2x128xf32>
      %c0_70 = arith.constant 0 : index
      %c0_71 = arith.constant 0 : index
      %141 = vector.load %arg8[%c0_70, %c0_71] : memref<2x128xf32, #tpu.memory_space<vmem>>, vector<2x128xf32>
      tpu.vector_store %arg8[%c0_70, %c0_71], %140 {strides = array<i32>} : memref<2x128xf32, #tpu.memory_space<vmem>>, vector<2x128xf32>,
    } else {
    }
    return
  }
  func.func @transform_0(%arg0: i32, %arg1: i32, %arg2: i32) -> (i32, i32) {
    %c0_i32 = arith.constant 0 : i32
    return %arg1, %arg2 : i32, i32
  }
  func.func @transform_1(%arg0: i32, %arg1: i32, %arg2: i32) -> (i32, i32) {
    %c0_i32 = arith.constant 0 : i32
    return %arg2, %arg0 : i32, i32
  }
  func.func @transform_2(%arg0: i32, %arg1: i32, %arg2: i32) -> (i32, i32) {
    %c0_i32 = arith.constant 0 : i32
    %c0_i32_0 = arith.constant 0 : i32
    return %c0_i32, %arg0 : i32, i32
  }
  func.func @transform_3(%arg0: i32, %arg1: i32, %arg2: i32) -> (i32, i32, i32) {
    %c0_i32 = arith.constant 0 : i32
    %c0_i32_0 = arith.constant 0 : i32
    return %arg1, %c0_i32, %arg0 : i32, i32, i32
  }
}

</mosaic_0001>

<bundles_post_ra>
// kernel: tpu_custom_call.1
= control target key start
LH: loop header
LB: loop body
LE: loop exit
PB: predicated region body
PF: predicated region fallthrough
CT: control target
= control target key end

     0   :  { %8 = vsyncpa [#allocation5], 0  ;;  %s482_s0 = inlined_call_operand.hbm [shape: bf16[16,128], index: 0, kind: input, shape index: {}]   ;;  %s483_s1 = inlined_call_operand.hbm [shape: bf16[128,128], index: 1, kind: input, shape index: {}]   ;;  %s484_s2 = inlined_call_operand.vmem [shape: f32[1,128], index: 2, kind: input, shape index: {}]   ;;  %s485_s3 = inlined_call_operand.hbm [shape: f32[8,2,128], index: 3, kind: output, shape index: {}]  }
   0x1   :  { %9 = vsyncpa [#allocation8], 0 }
   0x2   :  { %10 = vsyncpa [#allocation6], 0  ;;  %s423_s12 = smov [#allocation4]  }
   0x3   :  { %s16_s13 = sshll.u32 %s423_s12, 4  ;;  %s17_s13 = int_to_ptr.vmem [resolvable:$true] %s16_s13 }
   0x4   :  { %s365_s14 = scalar_lea.vmem %s17_s13, 128  ;;  %p370_p1 = scmp.lt.s32.totalorder %s17_s13, %s17_s13 }
   0x5   :  { %p366_p0 = scmp.ne.s32.totalorder %s17_s13, %s365_s14  ;;  %p371_p2 = scmp.lt.s32.totalorder %s365_s14, %s365_s14 }
   0x7   :  { %p372_p3 = por %p371_p2, %p370_p1 }
   0x9   :  { %p373_p4 = pnand %p372_p3, %p366_p0 }
   0xb   :  { %376 = shalt.err (!%p373_p4)
}
   0xc   :  { %s424_s15 = smov 64   ;;  %s425_s16 = smov 4  }
   0xd   :  { %22 = dma.hbm_to_vmem [thread:$0]  %s482_s0, 128, %s17_s13, [#allocation5], %s424_s15, %s424_s15, %s425_s16  }
   0xe   :  { %s426_s19 = smov [#allocation7]  }
   0xf   :  { %s28_s20 = sshll.u32 %s426_s19, 4  ;;  %s29_s20 = int_to_ptr.vmem [resolvable:$true] %s28_s20 }
  0x10   :  { %s385_s21 = scalar_lea.vmem %s29_s20, 1024  ;;  %p390_p6 = scmp.lt.s32.totalorder %s29_s20, %s29_s20 }
  0x11   :  { %p386_p5 = scmp.ne.s32.totalorder %s29_s20, %s385_s21  ;;  %p391_p7 = scmp.lt.s32.totalorder %s385_s21, %s385_s21 }
  0x13   :  { %p392_p8 = por %p391_p7, %p390_p6 }
  0x15   :  { %p393_p9 = pnand %p392_p8, %p386_p5 }
  0x17   :  { %396 = shalt.err (!%p393_p9)
}
  0x18   :  { %34 = dma.hbm_to_vmem [thread:$0]  %s483_s1, 1024, %s29_s20, [#allocation8], %s424_s15, %s424_s15, %s425_s16  }
  0x19   :  { %417 = dma.done.wait [#allocation5], 128  }
  0x1a   :  { %418 = vsyncadd [#allocation5], 4294967168 }
  0x1b   :  { %419 = dma.done.wait [#allocation8], 1024  }
  0x1c   :  { %420 = vsyncadd [#allocation8], 4294966272  ;;  %v427_v0 = vmov 0.0   ;;  %vm428_vm0 = vmmov 0   ;;  %v348_v1 = vld [vmem:[#allocation7 + $0x38] sm:$0xff]   ;;  %v349_v2 = vld [vmem:[#allocation7 + $0x30] sm:$0xff]  }
  0x1d   :  { %319 = vmatprep.subr.bf16.mxu0 %v427_v0  ;;  %50 = vst [vmem:[#allocation3] sm:$0x3] %v427_v0  ;;  %335 = vmatprep.mubr.msk.bf16.mxu0 %vm428_vm0, %v427_v0  ;;  %v350_v3 = vld [vmem:[#allocation7 + $0x28] sm:$0xff]   ;;  %v351_v4 = vld [vmem:[#allocation7 + $0x20] sm:$0xff]   ;;  %v352_v5 = vld [vmem:[#allocation7 + $0x18] sm:$0xff]  }
  0x1e   :  { %320 = vmatpush3.bf16.msra.mxu0 %v348_v1  ;;  %v353_v6 = vld [vmem:[#allocation7 + $0x10] sm:$0xff]   ;;  %v354_v7 = vld [vmem:[#allocation7 + $0x8] sm:$0xff]   ;;  %v355_v8 = vld [vmem:[#allocation7] sm:$0xff]  }
  0x1f   :  { %321 = vmatprep.subr.bf16.mxu0 %v427_v0  ;;  %v356_v9 = vld [vmem:[#allocation4] sm:$0xff]   ;;  %v301_v14 = vld [vmem:[%s484_s2] ss:$0 sm:$0xff]  ;;  %s429_s2 = smov [#allocation9]  }
  0x20   :  { %s279_s24 = sshll.u32 %s429_s2, 4  ;;  %s280_s24 = int_to_ptr.vmem [resolvable:$true] %s279_s24 }
  0x21   :  { %s397_s25 = scalar_lea.vmem %s280_s24, 256  ;;  %p402_p11 = scmp.lt.s32.totalorder %s280_s24, %s280_s24 }
  0x22   :  { %322 = vmatpush3.bf16.msra.mxu0 %v349_v2  ;;  %p398_p10 = scmp.ne.s32.totalorder %s280_s24, %s397_s25  ;;  %p403_p12 = scmp.lt.s32.totalorder %s397_s25, %s397_s25 }
  0x23   :  { %323 = vmatprep.subr.bf16.mxu0 %v427_v0 }
  0x24   :  { %v185_v15 = vld [vmem:[#allocation3] sm:$0x3]  ;;  %p404_p13 = por %p403_p12, %p402_p11 }
  0x26   :  { %324 = vmatpush3.bf16.msra.mxu0 %v350_v3  ;;  %p405_p0 = pnand %p404_p13, %p398_p10 }
  0x27   :  { %325 = vmatprep.subr.bf16.mxu0 %v427_v0 }
  0x2a   :  { %326 = vmatpush3.bf16.msra.mxu0 %v351_v4 }
  0x2b   :  { %327 = vmatprep.subr.bf16.mxu0 %v427_v0 }
  0x2e   :  { %328 = vmatpush3.bf16.msra.mxu0 %v352_v5 }
  0x2f   :  { %329 = vmatprep.subr.bf16.mxu0 %v427_v0 }
  0x32   :  { %330 = vmatpush3.bf16.msra.mxu0 %v353_v6 }
  0x33   :  { %331 = vmatprep.subr.bf16.mxu0 %v427_v0 }
  0x36   :  { %332 = vmatpush3.bf16.msra.mxu0 %v354_v7 }
  0x37   :  { %333 = vmatprep.subr.bf16.mxu0 %v427_v0 }
  0x3a   :  { %334 = vmatpush3.bf16.msra.mxu0 %v355_v8 }
  0x3d   :  { %336 = vmatmul.mubr.bf16.vlgmr.msra.gmra.mxu0 %v356_v9 }
  0xfd   :  { %v164_v10 = vpop.f32.mrf.mxu0 }
  0xfe   :  { %173 = vst [vmem:[#allocation2] sm:$0xff] %v164_v10 }
  0xff   :  { %v337_v11 = vpop.f32.mrf.mxu0 }
 0x101   :  { %v167_v12 = vpop.f32.mrf.mxu0 }
 0x102   :  { %174 = vst [vmem:[#allocation2 + $0x8] sm:$0xff] %v167_v12 }
 0x103   :  { %v338_v13 = vpop.f32.mrf.mxu0 }
 0x105   :  { %v186_v16 = vld [vmem:[#allocation2] sm:$0x3]  ;;  %v196_v20 = vld [vmem:[#allocation2 + $0x2] sm:$0x3]  ;;  %v207_v27 = vld [vmem:[#allocation2 + $0x4] sm:$0x3] }
 0x106   :  { %v187_v17 = vadd.f32 %v301_v14, %v186_v16  ;;  %v197_v22 = vadd.f32 %v301_v14, %v196_v20  ;;  %v208_v29 = vadd.f32 %v301_v14, %v207_v27  ;;  %v218_v34 = vld [vmem:[#allocation2 + $0x6] sm:$0x3] }
 0x107   :  { %v219_v36 = vadd.f32 %v301_v14, %v218_v34 }
 0x108   :  { %v188_v18 = vsub.f32 %v187_v17, %v185_v15 }
 0x109   :  { %v229_v41 = vld [vmem:[#allocation2 + $0x8] sm:$0x3]  ;;  %v240_v48 = vld [vmem:[#allocation2 + $0xa] sm:$0x3]  ;;  %v251_v55 = vld [vmem:[#allocation2 + $0xc] sm:$0x3] }
 0x10a   :  { %v189_v19 = vmul.f32 0.5, %v188_v18  ;;  %v230_v43 = vadd.f32 %v301_v14, %v229_v41  ;;  %v241_v50 = vadd.f32 %v301_v14, %v240_v48  ;;  %v252_v57 = vadd.f32 %v301_v14, %v251_v55  ;;  %v262_v62 = vld [vmem:[#allocation2 + $0xe] sm:$0x3] }
 0x10b   :  { %v263_v1 = vadd.f32 %v301_v14, %v262_v62 }
 0x10c   :  { %v190_v21 = vadd.f32 %v189_v19, %v185_v15 }
 0x10e   :  { %vm191_vm1 = vcmp.ge.f32.partialorder %v190_v21, 1.0 }
 0x10f   :  { %v302_v23 = vsel %vm191_vm1, 1.0, %v427_v0  ;;  %v195_v24 = vsel %vm191_vm1, 0.0, %v190_v21 }
 0x110   :  { %194 = vst [vmem:[#allocation9] sm:$0x3] %v302_v23  ;;  %v198_v25 = vsub.f32 %v197_v22, %v195_v24 }
 0x112   :  { %v199_v26 = vmul.f32 0.5, %v198_v25 }
 0x114   :  { %v200_v28 = vadd.f32 %v199_v26, %v195_v24 }
 0x116   :  { %vm201_vm2 = vcmp.ge.f32.partialorder %v200_v28, 1.0 }
 0x117   :  { %v303_v30 = vsel %vm201_vm2, 1.0, %v427_v0  ;;  %v206_v31 = vsel %vm201_vm2, 0.0, %v200_v28 }
 0x118   :  { %205 = vst [vmem:[#allocation9 + $0x2] sm:$0x3] %v303_v30  ;;  %v209_v32 = vsub.f32 %v208_v29, %v206_v31 }
 0x11a   :  { %v210_v33 = vmul.f32 0.5, %v209_v32 }
 0x11c   :  { %v211_v35 = vadd.f32 %v210_v33, %v206_v31 }
 0x11e   :  { %vm212_vm3 = vcmp.ge.f32.partialorder %v211_v35, 1.0 }
 0x11f   :  { %v304_v37 = vsel %vm212_vm3, 1.0, %v427_v0  ;;  %v217_v38 = vsel %vm212_vm3, 0.0, %v211_v35 }
 0x120   :  { %216 = vst [vmem:[#allocation9 + $0x4] sm:$0x3] %v304_v37  ;;  %v220_v39 = vsub.f32 %v219_v36, %v217_v38 }
 0x122   :  { %v221_v40 = vmul.f32 0.5, %v220_v39 }
 0x124   :  { %v222_v42 = vadd.f32 %v221_v40, %v217_v38 }
 0x126   :  { %vm223_vm4 = vcmp.ge.f32.partialorder %v222_v42, 1.0 }
 0x127   :  { %v305_v44 = vsel %vm223_vm4, 1.0, %v427_v0  ;;  %v228_v45 = vsel %vm223_vm4, 0.0, %v222_v42 }
 0x128   :  { %227 = vst [vmem:[#allocation9 + $0x6] sm:$0x3] %v305_v44  ;;  %v231_v46 = vsub.f32 %v230_v43, %v228_v45 }
 0x12a   :  { %v232_v47 = vmul.f32 0.5, %v231_v46 }
 0x12c   :  { %v233_v49 = vadd.f32 %v232_v47, %v228_v45 }
 0x12e   :  { %vm234_vm5 = vcmp.ge.f32.partialorder %v233_v49, 1.0 }
 0x12f   :  { %v306_v51 = vsel %vm234_vm5, 1.0, %v427_v0  ;;  %v239_v52 = vsel %vm234_vm5, 0.0, %v233_v49 }
 0x130   :  { %238 = vst [vmem:[#allocation9 + $0x8] sm:$0x3] %v306_v51  ;;  %v242_v53 = vsub.f32 %v241_v50, %v239_v52 }
 0x132   :  { %v243_v54 = vmul.f32 0.5, %v242_v53 }
 0x134   :  { %v244_v56 = vadd.f32 %v243_v54, %v239_v52 }
 0x136   :  { %vm245_vm6 = vcmp.ge.f32.partialorder %v244_v56, 1.0 }
 0x137   :  { %v307_v58 = vsel %vm245_vm6, 1.0, %v427_v0  ;;  %v250_v59 = vsel %vm245_vm6, 0.0, %v244_v56 }
 0x138   :  { %249 = vst [vmem:[#allocation9 + $0xa] sm:$0x3] %v307_v58  ;;  %v253_v60 = vsub.f32 %v252_v57, %v250_v59 }
 0x13a   :  { %v254_v61 = vmul.f32 0.5, %v253_v60 }
 0x13c   :  { %v255_v63 = vadd.f32 %v254_v61, %v250_v59 }
 0x13e   :  { %vm256_vm7 = vcmp.ge.f32.partialorder %v255_v63, 1.0 }
 0x13f   :  { %v308_v2 = vsel %vm256_vm7, 1.0, %v427_v0  ;;  %v261_v3 = vsel %vm256_vm7, 0.0, %v255_v63 }
 0x140   :  { %260 = vst [vmem:[#allocation9 + $0xc] sm:$0x3] %v308_v2  ;;  %v264_v4 = vsub.f32 %v263_v1, %v261_v3 }
 0x142   :  { %v265_v5 = vmul.f32 0.5, %v264_v4 }
 0x144   :  { %v266_v6 = vadd.f32 %v265_v5, %v261_v3 }
 0x146   :  { %vm267_vm8 = vcmp.ge.f32.partialorder %v266_v6, 1.0 }
 0x147   :  { %v309_v7 = vsel %vm267_vm8, 1.0, %v427_v0  ;;  %v272_v8 = vsel %vm267_vm8, 0.0, %v266_v6 }
 0x148   :  { %271 = vst [vmem:[#allocation9 + $0xe] sm:$0x3] %v309_v7  ;;  %273 = vst [vmem:[#allocation3] sm:$0x3] %v272_v8 }
 0x149   :  { %408 = shalt.err (!%p405_p0)
}
 0x14a   :  { %s430_s26 = smov 32   ;;  %s431_s27 = smov 2  }
 0x14b   :  { %285 = dma.vmem_to_hbm [thread:$0]  %s280_s24, 256, %s485_s3, [#allocation6], %s430_s26, %s430_s26, %s431_s27  }
 0x14c   :  { %421 = dma.done.wait [#allocation6], 256  }
 0x14d   :  { %422 = vsyncadd [#allocation6], 4294967040 }
 0x14e   :  { %289 = vsyncpa [#allocation5], 1 }
 0x14f   :  { %290 = vsyncpa [#allocation8], 1 }
 0x150   :  { %291 = vsyncpa [#allocation6], 1 }

</bundles_post_ra>
